<compile_context>
chip_gen: v5e
topology: v5e:2x2
jax: 0.10.0
libtpu: 0.0.40
codegen_flags: <defaults>
</compile_context>

<pallas_src>
import functools

import jax
import jax.numpy as jnp
from jax.experimental import pallas as pl
from jax.experimental.pallas import tpu as pltpu


# --------------------------------------------------------------------------
# In-kernel helpers
# --------------------------------------------------------------------------
def _one_hot_argmax(y):
    """One-hot (bool) of argmax along the last (lane) axis; first max wins.

    Uses a single (1, C) lane iota, broadcast inside the compares, instead of
    materializing a full (rt, C) int32 iota block.
    """
    C = y.shape[-1]
    iota = jax.lax.broadcasted_iota(jnp.int32, (1, C), 1)
    mx = jnp.max(y, axis=-1, keepdims=True)
    is_max = y >= mx
    idx = jnp.min(jnp.where(is_max, iota, jnp.int32(C)), axis=-1, keepdims=True)
    return iota == idx


def _gumbel_softmax_body(x, w, o_ref, *, inv_tau, tau_is_one, hard):
    """Shared training-path math.  x: f32 logits block; w = -log(u+eps)+eps."""
    if hard:
        # argmax(softmax((x+g)/tau)) == argmax(x + g): skip the softmax.
        y = x - jnp.log(w)
        o_ref[...] = _one_hot_argmax(y).astype(o_ref.dtype)
    elif tau_is_one:
        # exp(x + g - m) == exp(x - m) / w  (g = -log w): one fewer
        # transcendental per element; the extra reciprocal is a cheap approx
        # EUP op.  m = max(x) keeps everything well inside f32 range.
        m = jnp.max(x, axis=-1, keepdims=True)
        e = jnp.exp(x - m) * pl.reciprocal(w, approx=True)
        denom = jnp.sum(e, axis=-1, keepdims=True)
        o_ref[...] = (e * pl.reciprocal(denom, approx=True)).astype(o_ref.dtype)
    else:
        y = (x - jnp.log(w)) * jnp.float32(inv_tau)
        m = jnp.max(y, axis=-1, keepdims=True)
        e = jnp.exp(y - m)
        denom = jnp.sum(e, axis=-1, keepdims=True)
        o_ref[...] = (e * pl.reciprocal(denom, approx=True)).astype(o_ref.dtype)


def _uniform_from_bits(shape):
    """Uniform [0,1) f32 from 23 random mantissa bits (call prng_seed first).

    Can return exactly 0.0; the eps inside log(u + eps) keeps the Gumbel
    transform finite (tail differs negligibly from a true (0,1) uniform).
    """
    bits = pltpu.prng_random_bits(shape)
    if bits.dtype != jnp.uint32:
        bits = pltpu.bitcast(bits, jnp.uint32)
    mant = jnp.bitwise_and(bits, jnp.uint32(0x7FFFFF))
    return mant.astype(jnp.float32) * jnp.float32(1.0 / (1 << 23))


# --------------------------------------------------------------------------
# Kernels
# --------------------------------------------------------------------------
def _gs_train_noise_kernel(x_ref, n_ref, o_ref, *, inv_tau, tau_is_one, hard, eps):
    """Training path with an externally supplied Uniform(0,1) noise stream."""
    x = x_ref[...].astype(jnp.float32)
    u = n_ref[...].astype(jnp.float32)
    w = -jnp.log(u + jnp.float32(eps)) + jnp.float32(eps)
    _gumbel_softmax_body(x, w, o_ref, inv_tau=inv_tau,
                         tau_is_one=tau_is_one, hard=hard)


def _gs_train_prng_kernel(seed_ref, x_ref, o_ref, *, inv_tau, tau_is_one, hard, eps):
    """Training path; Gumbel noise generated on-chip (no noise HBM stream).

    Only used when running on a real TPU backend (prng_* has no CPU lowering).
    """
    # Multi-word seed (user seed, block index) -> decorrelated per-block streams.
    pltpu.prng_seed(seed_ref[0], pl.program_id(0))
    x = x_ref[...].astype(jnp.float32)
    u = _uniform_from_bits(x.shape)
    w = -jnp.log(u + jnp.float32(eps)) + jnp.float32(eps)
    _gumbel_softmax_body(x, w, o_ref, inv_tau=inv_tau,
                         tau_is_one=tau_is_one, hard=hard)


def _gs_eval_kernel(x_ref, o_ref):
    """Eval path: greedy one-hot argmax in the input dtype (no softmax)."""
    o_ref[...] = _one_hot_argmax(x_ref[...]).astype(o_ref.dtype)


# --------------------------------------------------------------------------
# Wrapper
# --------------------------------------------------------------------------
def _pick_row_tile(R, per_row_vmem_bytes, sublane, target_bytes=24 << 20):
    """Row tile sized so the whole VMEM working set (double-buffered streams +
    in-kernel temporaries) stays around `target_bytes`, rounded to the sublane
    pack, with >=4 grid steps when possible (>=2 per TensorCore on v7x)."""
    rt = max(sublane,
             (target_bytes // max(per_row_vmem_bytes, 1)) // sublane * sublane)
    r_ceil = pl.cdiv(R, sublane) * sublane
    rt = min(rt, r_ceil)
    # >= 4 grid steps so the double-buffered pipeline overlaps DMA with compute
    # even when the row axis is split across 2 TensorCores (v7x megacore).
    if pl.cdiv(r_ceil, rt) < 4 and r_ceil >= 4 * sublane:
        rt = max(sublane, (pl.cdiv(r_ceil, 4) // sublane) * sublane)
    return rt


def gumbel_softmax_forward(logits, noise=None, *, dim=-1, tau=1.0, hard=False,
                           eps=1e-10, training=True, seed=0, row_tile=None,
                           use_kernel_prng=None):
    """GumbelSoftmax forward with the hot path in Pallas.

    If `noise` is None, Uniform(0,1) samples are generated in-kernel with the
    hardware PRNG on real TPU backends; elsewhere (CPU / interpret) they are
    generated once in the wrapper with jax.random.  Passing an explicit `noise`
    array reproduces a deterministic reference exactly.
    """
    orig_dtype = logits.dtype
    ndim = logits.ndim
    d = dim + ndim if dim < 0 else dim
    last = ndim - 1

    # Move the softmax dim to the lane (last) axis.
    if d != last:
        logits = jnp.moveaxis(logits, d, -1)
        if noise is not None:
            noise = jnp.moveaxis(noise, d, -1)
    work_shape = logits.shape
    C = work_shape[-1]
    R = 1
    for s in work_shape[:-1]:
        R *= s

    x2 = logits.reshape(R, C)

    # Decide how the Gumbel noise is produced (training only).
    if use_kernel_prng is None:
        use_kernel_prng = jax.default_backend() == "tpu"
    n2 = None
    prng_path = False
    if training:
        if noise is not None:
            n2 = noise.reshape(R, C)
        elif use_kernel_prng:
            prng_path = True
        else:
            # Fallback for non-TPU / interpret runs: stream noise from HBM.
            n2 = jax.random.uniform(jax.random.PRNGKey(int(seed)), (R, C),
                                    dtype=jnp.float32)

    x_item = jnp.dtype(orig_dtype).itemsize
    out_item = x_item
    noise_streamed = training and (n2 is not None)
    sublane = 8 if max(x_item, out_item) >= 4 else 16

    # Honest per-row VMEM footprint: double-buffered in/out/noise streams plus
    # ~6 full-size f32/int32 temporaries, all lane-padded to a 128 multiple.
    lane_pad = pl.cdiv(C, 128) * 128
    noise_bytes = 4 if noise_streamed else 0
    per_row_vmem = lane_pad * (2 * (x_item + out_item + noise_bytes) + 6 * 4)

    if row_tile is None:
        rt = _pick_row_tile(R, per_row_vmem, sublane)
    else:
        rt = max(sublane, (int(row_tile) // sublane) * sublane)

    # Ragged final row block is handled by Pallas (garbage rows computed,
    # their writes dropped) -> no wrapper pad, no post-kernel slice.
    grid = (pl.cdiv(R, rt),)
    block = (rt, C)          # full-C lane blocks: no class-axis pad either.

    vmem_needed = rt * per_row_vmem
    # Cap below v7x's 64 MiB per-TC VMEM; auto-picked tiles stay well under.
    vmem_limit = int(min(48 << 20, max(16 << 20, int(vmem_needed * 1.5))))

    cparams = pltpu.CompilerParams(
        dimension_semantics=("parallel",),
        vmem_limit_bytes=vmem_limit,
    )
    out_shape = jax.ShapeDtypeStruct((R, C), orig_dtype)
    tau_is_one = abs(float(tau) - 1.0) < 1e-12

    if not training:
        out2 = pl.pallas_call(
            _gs_eval_kernel,
            out_shape=out_shape,
            grid_spec=pltpu.PrefetchScalarGridSpec(
                num_scalar_prefetch=0,
                grid=grid,
                in_specs=[pl.BlockSpec(block, lambda i: (i, 0))],
                out_specs=pl.BlockSpec(block, lambda i: (i, 0)),
            ),
            compiler_params=cparams,
        )(x2)
    elif prng_path:
        kernel = functools.partial(
            _gs_train_prng_kernel, inv_tau=1.0 / float(tau),
            tau_is_one=tau_is_one, hard=bool(hard), eps=float(eps))
        seed_arr = jnp.asarray([seed], dtype=jnp.int32)
        out2 = pl.pallas_call(
            kernel,
            out_shape=out_shape,
            grid_spec=pltpu.PrefetchScalarGridSpec(
                num_scalar_prefetch=1,
                grid=grid,
                in_specs=[pl.BlockSpec(block, lambda i, s: (i, 0))],
                out_specs=pl.BlockSpec(block, lambda i, s: (i, 0)),
            ),
            compiler_params=cparams,
        )(seed_arr, x2)
    else:
        kernel = functools.partial(
            _gs_train_noise_kernel, inv_tau=1.0 / float(tau),
            tau_is_one=tau_is_one, hard=bool(hard), eps=float(eps))
        out2 = pl.pallas_call(
            kernel,
            out_shape=out_shape,
            grid_spec=pltpu.PrefetchScalarGridSpec(
                num_scalar_prefetch=0,
                grid=grid,
                in_specs=[pl.BlockSpec(block, lambda i: (i, 0)),
                          pl.BlockSpec(block, lambda i: (i, 0))],
                out_specs=pl.BlockSpec(block, lambda i: (i, 0)),
            ),
            compiler_params=cparams,
        )(x2, n2)

    out = out2.reshape(work_shape)
    if d != last:
        out = jnp.moveaxis(out, -1, d)
    return out


# --------------------------------------------------------------------------
# Pure-JAX reference + self-test
# --------------------------------------------------------------------------
def _reference(logits, noise, *, tau, hard, eps, training, dim=-1):
    n_classes = logits.shape[dim]
    if training:
        g = -jnp.log(-jnp.log(noise + eps) + eps)
        soft = jax.nn.softmax((logits + g) / tau, axis=dim)
        if hard:
            idx = jnp.argmax(soft, axis=dim)
            return jax.nn.one_hot(idx, n_classes, dtype=logits.dtype, axis=dim)
        return soft
    idx = jnp.argmax(logits, axis=dim)
    return jax.nn.one_hot(idx, n_classes, dtype=logits.dtype, axis=dim)


if __name__ == "__main__":
    key = jax.random.PRNGKey(0)
    k_logits, k_noise, k_extra = jax.random.split(key, 3)

    # Small shapes: batch=2, seq=8, classes=32; softmax over dim=-1.
    B, S, C = 2, 8, 32
    logits = jax.random.normal(k_logits, (B, S, C), dtype=jnp.float32)
    noise = jax.random.uniform(k_noise, (B, S, C), dtype=jnp.float32,
                               minval=1e-6, maxval=1.0 - 1e-6)

    # 1) Training, soft, explicit noise -> matches the JAX reference.
    out_train = gumbel_softmax_forward(logits, noise, tau=1.0, hard=False,
                                       eps=1e-10, training=True)
    out_train = jax.block_until_ready(out_train)
    ref_train = _reference(logits, noise, tau=1.0, hard=False, eps=1e-10,
                           training=True)
    # approx reciprocal -> relaxed tolerance
    assert jnp.allclose(out_train, ref_train, atol=5e-3, rtol=5e-3)
    assert jnp.allclose(jnp.sum(out_train, axis=-1), 1.0, atol=5e-3)

    # 1b) Training, soft, explicit noise, tau != 1 (non-folded path).
    out_tau = gumbel_softmax_forward(logits, noise, tau=0.5, hard=False,
                                     eps=1e-10, training=True)
    out_tau = jax.block_until_ready(out_tau)
    ref_tau = _reference(logits, noise, tau=0.5, hard=False, eps=1e-10,
                         training=True)
    assert jnp.allclose(out_tau, ref_tau, atol=5e-3, rtol=5e-3)

    # 2) Training, hard (straight-through forward), explicit noise -> exact one-hot.
    out_hard = gumbel_softmax_forward(logits, noise, tau=1.0, hard=True,
                                      training=True)
    out_hard = jax.block_until_ready(out_hard)
    ref_hard = _reference(logits, noise, tau=1.0, hard=True, eps=1e-10,
                          training=True)
    assert jnp.allclose(out_hard, ref_hard)

    # 3) Eval path (greedy one-hot softmax).
    out_eval = gumbel_softmax_forward(logits, training=False)
    out_eval = jax.block_until_ready(out_eval)
    ref_eval = _reference(logits, noise, tau=1.0, hard=False, eps=1e-10,
                          training=False)
    assert jnp.allclose(out_eval, ref_eval)

    # 4) Training, soft, no explicit noise (in-kernel PRNG on real TPU,
    #    wrapper-generated noise elsewhere).
    out_prng = gumbel_softmax_forward(logits, tau=1.0, hard=False,
                                      training=True, seed=42)
    out_prng = jax.block_until_ready(out_prng)
    assert out_prng.shape == logits.shape
    assert jnp.allclose(jnp.sum(out_prng, axis=-1), 1.0, atol=5e-3)
    assert bool(jnp.all(out_prng >= 0.0)) and bool(jnp.all(out_prng <= 1.0 + 1e-5))

    # 5) Non-last softmax dim + non-sublane-multiple row count (R = 15).
    logits2 = jax.random.normal(k_extra, (3, 32, 5), dtype=jnp.float32)
    out_dim1 = gumbel_softmax_forward(logits2, training=False, dim=1)
    out_dim1 = jax.block_until_ready(out_dim1)
    ref_dim1 = jax.nn.one_hot(jnp.argmax(logits2, axis=1), 32,
                              dtype=logits2.dtype, axis=1)
    assert jnp.allclose(out_dim1, ref_dim1)

    print("KERNEL_OK")
</pallas_src>

<mosaic_0001>
module attributes {stable_mosaic.version = 11 : i64} {
  func.func @_gs_train_noise_kernel(%arg0: i32, %arg1: memref<16x32xf32, #tpu.memory_space<vmem>>, %arg2: memref<16x32xf32, #tpu.memory_space<vmem>>, %arg3: memref<16x32xf32, #tpu.memory_space<vmem>>) attributes {dimension_semantics = [#tpu.dimension_semantics<parallel>], iteration_bounds = array<i64: 1>, scalar_prefetch = 0 : i64, scratch_operands = 0 : i64, tpu.core_type = #tpu.core_type<tc>, window_params = [{transform_indices = @transform_0, window_bounds = array<i64: 16, 32>}, {transform_indices = @transform_1, window_bounds = array<i64: 16, 32>}, {transform_indices = @transform_2, window_bounds = array<i64: 16, 32>}]} {
    %c0 = arith.constant 0 : index
    %c0_0 = arith.constant 0 : index
    %0 = vector.load %arg1[%c0, %c0_0] : memref<16x32xf32, #tpu.memory_space<vmem>>, vector<16x32xf32>
    %c0_1 = arith.constant 0 : index
    %c0_2 = arith.constant 0 : index
    %1 = vector.load %arg2[%c0_1, %c0_2] : memref<16x32xf32, #tpu.memory_space<vmem>>, vector<16x32xf32>
    %cst = arith.constant 1.000000e-10 : f32
    %2 = vector.broadcast %cst : f32 to vector<16x32xf32>
    %3 = arith.addf %1, %2 : vector<16x32xf32>
    %4 = math.log %3 : vector<16x32xf32>
    %cst_3 = arith.constant 0.000000e+00 : f32
    %5 = vector.broadcast %cst_3 : f32 to vector<16x32xf32>
    %6 = arith.subf %5, %4 : vector<16x32xf32>
    %cst_4 = arith.constant 1.000000e-10 : f32
    %7 = vector.broadcast %cst_4 : f32 to vector<16x32xf32>
    %8 = arith.addf %6, %7 : vector<16x32xf32>
    %cst_5 = arith.constant dense<0xFF800000> : vector<16xf32>
    %9 = vector.multi_reduction <maximumf>, %0, %cst_5 [1] : vector<16x32xf32> to vector<16xf32>
    %10 = vector.shape_cast %9 : vector<16xf32> to vector<16x1xf32>
    %11 = vector.broadcast %10 : vector<16x1xf32> to vector<16x32xf32>
    %12 = arith.subf %0, %11 : vector<16x32xf32>
    %13 = math.exp %12 : vector<16x32xf32>
    %14 = tpu.reciprocal %8 {approx = true} : vector<16x32xf32> -> vector<16x32xf32>
    %15 = arith.mulf %13, %14 : vector<16x32xf32>
    %cst_6 = arith.constant dense<0.000000e+00> : vector<16xf32>
    %16 = vector.multi_reduction <add>, %15, %cst_6 [1] : vector<16x32xf32> to vector<16xf32>
    %17 = vector.shape_cast %16 : vector<16xf32> to vector<16x1xf32>
    %18 = tpu.reciprocal %17 {approx = true} : vector<16x1xf32> -> vector<16x1xf32>
    %19 = vector.broadcast %18 : vector<16x1xf32> to vector<16x32xf32>
    %20 = arith.mulf %15, %19 : vector<16x32xf32>
    %c0_7 = arith.constant 0 : index
    %c0_8 = arith.constant 0 : index
    %21 = vector.load %arg3[%c0_7, %c0_8] : memref<16x32xf32, #tpu.memory_space<vmem>>, vector<16x32xf32>
    tpu.vector_store %arg3[%c0_7, %c0_8], %20 {strides = array<i32>} : memref<16x32xf32, #tpu.memory_space<vmem>>, vector<16x32xf32>,
    return
  }
  func.func @transform_0(%arg0: i32) -> (i32, i32) {
    %c0_i32 = arith.constant 0 : i32
    %c0_i32_0 = arith.constant 0 : i32
    return %arg0, %c0_i32 : i32, i32
  }
  func.func @transform_1(%arg0: i32) -> (i32, i32) {
    %c0_i32 = arith.constant 0 : i32
    %c0_i32_0 = arith.constant 0 : i32
    return %arg0, %c0_i32 : i32, i32
  }
  func.func @transform_2(%arg0: i32) -> (i32, i32) {
    %c0_i32 = arith.constant 0 : i32
    %c0_i32_0 = arith.constant 0 : i32
    return %arg0, %c0_i32 : i32, i32
  }
}

</mosaic_0001>

<bundles_post_ra>
// kernel: tpu_custom_call.1
= control target key start
LH: loop header
LB: loop body
LE: loop exit
PB: predicated region body
PF: predicated region fallthrough
CT: control target
= control target key end

     0   :  { %7 = vsyncpa [#allocation3], 0  ;;  %s250_s0 = inlined_call_operand.hbm [shape: f32[16,32], index: 0, kind: input, shape index: {}]   ;;  %s251_s1 = inlined_call_operand.hbm [shape: f32[16,32], index: 1, kind: input, shape index: {}]   ;;  %s252_s2 = inlined_call_operand.hbm [shape: f32[16,32], index: 2, kind: output, shape index: {}]  }
   0x1   :  { %8 = vsyncpa [#allocation6], 0 }
   0x2   :  { %9 = vsyncpa [#allocation4], 0  ;;  %s14_s11 = sshll.u32 %s250_s0, 4  ;;  %s206_s12 = smov [#allocation2]   ;;  %s15_s11 = int_to_ptr.hbm [resolvable:$true] %s14_s11 }
   0x3   :  { %s16_s13 = sshll.u32 %s206_s12, 4  ;;  %s27_s16 = sshll.u32 %s251_s1, 4  ;;  %s17_s13 = int_to_ptr.vmem [resolvable:$true] %s16_s13  ;;  %s28_s16 = int_to_ptr.hbm [resolvable:$true] %s27_s16 }
   0x4   :  { %s207_s17 = smov 128   ;;  %s208_s18 = smov 8  }
   0x5   :  { %22 = dma.hbm_to_vmem [thread:$0]  %s15_s11, 256, %s17_s13, [#allocation3], %s207_s17, %s207_s17, %s208_s18  }
   0x6   :  { %s209_s19 = smov [#allocation5]  }
   0x7   :  { %s29_s20 = sshll.u32 %s209_s19, 4  ;;  %s30_s20 = int_to_ptr.vmem [resolvable:$true] %s29_s20 }
   0x8   :  { %35 = dma.hbm_to_vmem [thread:$0]  %s28_s16, 256, %s30_s20, [#allocation6], %s207_s17, %s207_s17, %s208_s18  }
   0x9   :  { %200 = dma.done.wait [#allocation3], 256  }
   0xa   :  { %201 = vsyncadd [#allocation3], 4294967040 }
   0xb   :  { %202 = dma.done.wait [#allocation6], 256  }
   0xc   :  { %203 = vsyncadd [#allocation6], 4294967040  ;;  %vm58_vm0 = vcmask 261120   ;;  %v44_v0 = vld [vmem:[#allocation2] sm:$0xff]  ;;  %v45_v2 = vld [vmem:[#allocation2 + $0x8] sm:$0xff]  ;;  %s210_s0 = smov [#allocation7]  }
   0xd   :  { %v59_v1 = vsel %vm58_vm0, %v44_v0, -inf  ;;  %v62_v3 = vsel %vm58_vm0, %v45_v2, -inf  ;;  %v46_v4 = vld [vmem:[#allocation5] sm:$0xff]  ;;  %v47_v6 = vld [vmem:[#allocation5 + $0x8] sm:$0xff]  ;;  %s91_s1 = sshll.u32 %s210_s0, 4  ;;  %s93_s23 = sshll.u32 %s252_s2, 4  ;;  %s92_s1 = int_to_ptr.vmem [resolvable:$true] %s91_s1  ;;  %s94_s23 = int_to_ptr.hbm [resolvable:$true] %s93_s23 }
   0xe   :  { %60 = vmax.xlane.f32.xlu0 %v59_v1  ;;  %v48_v5 = vadd.f32 1e-10, %v46_v4  ;;  %v49_v7 = vadd.f32 1e-10, %v47_v6 }
  0x10   :  { %112 = vlog2.f32 %v48_v5 }
  0x11   :  { %114 = vlog2.f32 %v49_v7 }
  0x16   :  { %63 = vmax.xlane.f32.xlu0 %v62_v3  ;;  %v113_v8 = vpop.eup %112 }
  0x17   :  { %v51_v9 = vmul.f32 0.6931472, %v113_v8  ;;  %v115_v11 = vpop.eup %114 }
  0x18   :  { %v53_v13 = vmul.f32 0.6931472, %v115_v11 }
  0x19   :  { %v54_v10 = vsub.f32 0.0, %v51_v9 }
  0x1a   :  { %v55_v17 = vsub.f32 0.0, %v53_v13 }
  0x1b   :  { %v56_v12 = vadd.f32 1e-10, %v54_v10 }
  0x1c   :  { %v57_v18 = vadd.f32 1e-10, %v55_v17 }
  0x1d   :  { %116 = vrcp.f32 %v56_v12 }
  0x23   :  { %v117_v20 = vpop.eup %116 }
  0x81   :  { %v61_v14 = vpop.xlane.xlu0 %60 }
  0x82   :  { %v65_v15 = vsub.f32 %v44_v0, %v61_v14 }
  0x84   :  { %v67_v16 = vmul.f32 1.442695, %v65_v15 }
  0x86   :  { %118 = vpow2.f32 %v67_v16 }
  0x87   :  { %120 = vrcp.f32 %v57_v18 }
  0x89   :  { %v64_v19 = vpop.xlane.xlu0 %63 }
  0x8a   :  { %v66_v21 = vsub.f32 %v45_v2, %v64_v19 }
  0x8c   :  { %v119_v22 = vpop.eup %118  ;;  %v69_v23 = vmul.f32 1.442695, %v66_v21 }
  0x8d   :  { %v73_v24 = vmul.f32 %v119_v22, %v117_v20  ;;  %v121_v26 = vpop.eup %120 }
  0x8e   :  { %122 = vpow2.f32 %v69_v23 }
  0x8f   :  { %v75_v25 = vsel %vm58_vm0, %v73_v24, 0.0 }
  0x90   :  { %76 = vadd.xlane.f32.xlu1 %v75_v25 }
  0x94   :  { %v123_v27 = vpop.eup %122 }
  0x95   :  { %v74_v28 = vmul.f32 %v123_v27, %v121_v26 }
  0x97   :  { %v78_v29 = vsel %vm58_vm0, %v74_v28, 0.0 }
  0x98   :  { %79 = vadd.xlane.f32.xlu1 %v78_v29 }
 0x103   :  { %v77_v30 = vpop.xlane.xlu1 %76 }
 0x104   :  { %124 = vrcp.f32 %v77_v30 }
 0x10a   :  { %v125_v31 = vpop.eup %124 }
 0x10b   :  { %v83_v32 = vmul.f32 %v125_v31, %v73_v24  ;;  %v80_v33 = vpop.xlane.xlu1 %79 }
 0x10c   :  { %126 = vrcp.f32 %v80_v33 }
 0x10d   :  { %85 = vst.msk [vmem:[#allocation7] sm:$0xff] %vm58_vm0, %v83_v32 }
 0x112   :  { %v127_v34 = vpop.eup %126 }
 0x113   :  { %v84_v35 = vmul.f32 %v127_v34, %v74_v28 }
 0x115   :  { %86 = vst.msk [vmem:[#allocation7 + $0x8] sm:$0xff] %vm58_vm0, %v84_v35 }
 0x116   :  { %99 = dma.vmem_to_hbm [thread:$0]  %s92_s1, 256, %s94_s23, [#allocation4], %s207_s17, %s207_s17, %s208_s18  }
 0x117   :  { %204 = dma.done.wait [#allocation4], 256  }
 0x118   :  { %205 = vsyncadd [#allocation4], 4294967040 }
 0x119   :  { %104 = vsyncpa [#allocation3], 1 }
 0x11a   :  { %105 = vsyncpa [#allocation6], 1 }
 0x11b   :  { %106 = vsyncpa [#allocation4], 1 }

</bundles_post_ra>
